<compile_context>
chip_gen: v7x
topology: tpu7x:2x2x1
jax: 0.10.0
libtpu: 0.0.40
codegen_flags: <defaults>
</compile_context>

<pallas_src>
import jax
import jax.numpy as jnp
from jax.experimental import pallas as pl
from jax.experimental.pallas import tpu as pltpu


def _bernoulli_fwd_kernel(x_ref, w_ref, o_ref):
    # x_ref: (tile_b, P) input dtype, w_ref: (P, 1) f32, o_ref: (tile_b, 1) f32
    xv = x_ref[...].astype(jnp.float32)
    o_ref[...] = jnp.dot(xv, w_ref[...], preferred_element_type=jnp.float32)


def bernoulli_forward(x, n_w, *, tile_b=None):
    """x: (B, P), n_w: (P,) -> (B,) float32 == sum(x * n_w, axis=-1)."""
    B, P = x.shape
    w2d = jnp.asarray(n_w, jnp.float32).reshape(P, 1)   # tiny (P,1) weight, f32
    itemsize = jnp.dtype(x.dtype).itemsize

    if tile_b is None:
        if B <= 1024:
            # Tiny problem: one grid step, block equals the full array.
            tile_b = B
        else:
            # ~6 MiB per x buffer; double-buffered ~12 MiB => fits the default
            # scoped VMEM on v5e (16 MiB), v6e (32 MiB) and v7x (32 MiB).
            budget = 6 * 1024 * 1024
            tile_b = max(256, (budget // (P * itemsize)) // 256 * 256)
            # Keep >= 2 grid steps so the "parallel" axis can shard across
            # v7x's two TensorCores.
            half_rounded = -(-((B + 1) // 2) // 256) * 256
            tile_b = min(tile_b, half_rounded)

    if tile_b < B and tile_b % 8 != 0:
        tile_b = -(-tile_b // 8) * 8   # sublane alignment for non-full blocks

    grid_b = pl.cdiv(B, tile_b)        # partial last block instead of jnp.pad

    out = pl.pallas_call(
        _bernoulli_fwd_kernel,
        out_shape=jax.ShapeDtypeStruct((B, 1), jnp.float32),
        grid=(grid_b,),
        in_specs=[
            pl.BlockSpec((tile_b, P), lambda i: (i, 0)),   # contiguous x slab
            pl.BlockSpec((P, 1), lambda i: (0, 0)),        # shared weights
        ],
        out_specs=pl.BlockSpec((tile_b, 1), lambda i: (i, 0)),
        compiler_params=pltpu.CompilerParams(
            dimension_semantics=("parallel",),
        ),
    )(x, w2d)
    return out[:, 0]


def make_params(p=100, alpha=0.1, beta=0.8, seed=0):
    """Deterministic re-implementation of the module __init__ parameter setup."""
    key = jax.random.PRNGKey(seed)
    k_prob, k_x0 = jax.random.split(key)
    bits = jax.random.randint(k_prob, (p,), 0, 2).astype(jnp.float32)
    prob = bits * beta + alpha
    n_w = jnp.log(prob) - jnp.log(1.0 - prob)
    # x0 ~ Bernoulli(0.5), shape (1, p)  (used by .trace, not by forward)
    x0 = (jax.random.uniform(k_x0, (1, p)) < 0.5).astype(jnp.float32)
    return n_w, x0


def _ref_forward(x, n_w):
    # Exact f32 reference.
    return jnp.sum(x.astype(jnp.float32) * n_w.astype(jnp.float32)[None, :], axis=-1)


if __name__ == "__main__":
    p = 100          # matches module default self.p = 100
    batch = 8

    n_w, _x0 = make_params(p=p, alpha=0.1, beta=0.8, seed=0)

    kx = jax.random.PRNGKey(0)
    x = (jax.random.uniform(kx, (batch, p)) < 0.5).astype(jnp.float32)

    # --- small default shape: single grid step, block = full array ---
    out = jax.block_until_ready(bernoulli_forward(x, n_w))
    ref = _ref_forward(x, n_w)
    assert out.shape == (batch,)
    assert jnp.allclose(out, ref, atol=5e-3, rtol=5e-3)

    # --- exercise the multi-step path with a partial last block (no padding) ---
    kx2 = jax.random.PRNGKey(1)
    x_big = (jax.random.uniform(kx2, (1000, p)) < 0.5).astype(jnp.float32)
    out_big = jax.block_until_ready(bernoulli_forward(x_big, n_w, tile_b=256))
    ref_big = _ref_forward(x_big, n_w)
    assert out_big.shape == (1000,)
    assert jnp.allclose(out_big, ref_big, atol=5e-3, rtol=5e-3)

    print("KERNEL_OK")
</pallas_src>

<mosaic_0001>
module attributes {stable_mosaic.version = 11 : i64} {
  func.func @_bernoulli_fwd_kernel(%arg0: i32, %arg1: memref<8x100xf32, #tpu.memory_space<vmem>>, %arg2: memref<100x1xf32, #tpu.memory_space<vmem>>, %arg3: memref<8x1xf32, #tpu.memory_space<vmem>>) attributes {dimension_semantics = [#tpu.dimension_semantics<parallel>], iteration_bounds = array<i64: 1>, scalar_prefetch = 0 : i64, scratch_operands = 0 : i64, tpu.core_type = #tpu.core_type<tc>, window_params = [{transform_indices = @transform_0, window_bounds = array<i64: 8, 100>}, {pipeline_mode = #tpu.pipeline_mode<synchronous>, transform_indices = @transform_1, window_bounds = array<i64: 100, 1>}, {transform_indices = @transform_2, window_bounds = array<i64: 8, 1>}]} {
    %c0 = arith.constant 0 : index
    %c0_0 = arith.constant 0 : index
    %0 = vector.load %arg1[%c0, %c0_0] : memref<8x100xf32, #tpu.memory_space<vmem>>, vector<8x100xf32>
    %c0_1 = arith.constant 0 : index
    %c0_2 = arith.constant 0 : index
    %1 = vector.load %arg2[%c0_1, %c0_2] : memref<100x1xf32, #tpu.memory_space<vmem>>, vector<100x1xf32>
    %cst = arith.constant dense<0.000000e+00> : vector<8x1xf32>
    %2 = tpu.matmul %0, %1, %cst {dimension_numbers = #tpu.dot_dimension_numbers<[1], [0], [0], [1], [0, 0, 1, 1], [], []>} : vector<8x100xf32>, vector<100x1xf32>, vector<8x1xf32> -> vector<8x1xf32>
    %c0_3 = arith.constant 0 : index
    %c0_4 = arith.constant 0 : index
    %3 = vector.load %arg3[%c0_3, %c0_4] : memref<8x1xf32, #tpu.memory_space<vmem>>, vector<8x1xf32>
    tpu.vector_store %arg3[%c0_3, %c0_4], %2 {strides = array<i32>} : memref<8x1xf32, #tpu.memory_space<vmem>>, vector<8x1xf32>,
    return
  }
  func.func @transform_0(%arg0: i32) -> (i32, i32) {
    %c0_i32 = arith.constant 0 : i32
    %c0_i32_0 = arith.constant 0 : i32
    return %arg0, %c0_i32 : i32, i32
  }
  func.func @transform_1(%arg0: i32) -> (i32, i32) {
    %c0_i32 = arith.constant 0 : i32
    %c0_i32_0 = arith.constant 0 : i32
    %c0_i32_1 = arith.constant 0 : i32
    return %c0_i32, %c0_i32_0 : i32, i32
  }
  func.func @transform_2(%arg0: i32) -> (i32, i32) {
    %c0_i32 = arith.constant 0 : i32
    %c0_i32_0 = arith.constant 0 : i32
    return %arg0, %c0_i32 : i32, i32
  }
}

</mosaic_0001>

<bundles_post_ra>
// kernel: tpu_custom_call.1
= control target key start
LH: loop header
LB: loop body
LE: loop exit
PB: predicated region body
PF: predicated region fallthrough
CT: control target
= control target key end

     0   :  { %v175_v0 = vmov 0.0|0.0   ;;  %vm176_vm0 = vmmov 0   ;;  %v177_v4 = vmov 0.0   ;;  %vm29_vm1 = vcmask 1043456   ;;  %s238_s1 = inlined_call_operand.vmem [shape: f32[100,1], index: 1, kind: input, shape index: {}]   ;;  %s239_s0 = inlined_call_operand.vmem [shape: f32[8,100], index: 0, kind: input, shape index: {}]   ;;  %s240_s2 = inlined_call_operand.vmem [shape: f32[8,1], index: 2, kind: output, shape index: {}]  }
   0x1   :  { %154 = vmatprep.subr.bf16.mxu0 %v175_v0  ;;  %v12_v1 = vld [vmem:[%s238_s1] sm:$0xff]  ;;  %v13_v2 = vld [vmem:[%s238_s1 + $0x8] sm:$0xff]  ;;  %v14_v3 = vld [vmem:[%s238_s1 + $0x10] sm:$0xff]  ;;  %151 = vmatprep.mubr.msk.f32.mxu0 %vm176_vm0, %v177_v4  ;;  %vm25_vm2 = vcmask 818176   ;;  %vm103_vm3 = vcmask 7168  }
   0x2   :  { %v155_v5 = vpack.c.bf16 %v13_v2, %v12_v1  ;;  %v15_v6 = vld [vmem:[%s238_s1 + $0x18] sm:$0xff]  ;;  %v16_v8 = vld [vmem:[%s238_s1 + $0x20] sm:$0xff]  ;;  %v17_v9 = vld [vmem:[%s238_s1 + $0x28] sm:$0xff] }
   0x3   :  { %v158_v7 = vpack.c.bf16 %v15_v6, %v14_v3  ;;  %v161_v10 = vpack.c.bf16 %v17_v9, %v16_v8  ;;  %v18_v11 = vld [vmem:[%s238_s1 + $0x30] sm:$0xff]  ;;  %v19_v12 = vld [vmem:[%s238_s1 + $0x38] sm:$0xff]  ;;  %v20_v14 = vld [vmem:[%s238_s1 + $0x40] sm:$0xff] }
   0x4   :  { %156 = vmatpush3.bf16.msra.mxu0 %v155_v5  ;;  %v164_v13 = vpack.c.bf16 %v19_v12, %v18_v11  ;;  %v21_v15 = vld [vmem:[%s238_s1 + $0x48] sm:$0xff]  ;;  %v22_v17 = vld [vmem:[%s238_s1 + $0x50] sm:$0xff]  ;;  %v23_v18 = vld [vmem:[%s238_s1 + $0x58] sm:$0xff] }
   0x5   :  { %157 = vmatprep.subr.bf16.mxu0 %v175_v0  ;;  %v167_v16 = vpack.c.bf16 %v21_v15, %v20_v14  ;;  %v170_v19 = vpack.c.bf16 %v23_v18, %v22_v17  ;;  %v24_v20 = vld [vmem:[%s238_s1 + $0x60] sm:$0xf] }
   0x6   :  { %v11_v21 = vld [vmem:[%s239_s0] sm:$0xff] }
   0x8   :  { %159 = vmatpush3.bf16.msra.mxu0 %v158_v7 }
   0x9   :  { %160 = vmatprep.subr.bf16.mxu0 %v175_v0 }
   0xc   :  { %162 = vmatpush3.bf16.msra.mxu0 %v161_v10 }
   0xd   :  { %163 = vmatprep.subr.bf16.mxu0 %v175_v0 }
  0x10   :  { %165 = vmatpush3.bf16.msra.mxu0 %v164_v13 }
  0x11   :  { %166 = vmatprep.subr.bf16.mxu0 %v175_v0 }
  0x14   :  { %168 = vmatpush3.bf16.msra.mxu0 %v167_v16 }
  0x15   :  { %169 = vmatprep.subr.bf16.mxu0 %v175_v0 }
  0x18   :  { %171 = vmatpush3.bf16.msra.mxu0 %v170_v19 }
  0x19   :  { %149 = vmatprep.subr.mxu0 %v177_v4 }
  0x1c   :  { %150 = vmatpush3.msk.msra.mxu0 %vm29_vm1, %v24_v20 }
  0x1d   :  { %152 = vmatmul.mubr.msk.f32.vlgmr.msra.gmra.mrb[0].mxu0 %vm25_vm2, %v11_v21 }
  0xf0   :  { %v99_v22 = vpop.f32.mrb[0].mxu0 }
  0xf1   :  { %104 = vst.msk [vmem:[%s240_s2] sm:$0xff] %vm103_vm3, %v99_v22  ;;  %v153_v23 = vpop.f32.mrb[1].mxu0 }

</bundles_post_ra>
